<compile_context>
chip_gen: v5e
topology: v5e:2x2
jax: 0.10.0
libtpu: 0.0.40
codegen_flags: <defaults>
</compile_context>

<pallas_src>
import functools

import jax
import jax.numpy as jnp
from jax import lax
from jax.experimental import pallas as pl
from jax.experimental.pallas import tpu as pltpu


def _round_up(x, m):
    return (x + m - 1) // m * m


def _lgm_kernel(feat_ref, label_ref, rhs_ref, c_row_ref, slog_ref,
                logits_ref, mlogits_ref, *, alpha, num_classes):
    feat = feat_ref[...]          # [TB, Dp]  f32
    label = label_ref[...]        # [TB, 1]   int32
    rhs = rhs_ref[...]            # [Cp, 2Dp] f32  (= [inv_cov | -2*centers*inv_cov])
    c_row = c_row_ref[...]        # [1, Cp]   f32  (= sum_d centers^2 * inv_cov)
    slog = slog_ref[...]          # [1, Cp]   f32  (= sum_d log_covs)

    tb, cp = logits_ref.shape

    # dist[b,c] = sum_d (feat[b,d]-centers[c,d])^2 / covs[c,d]
    #           = [feat^2 | feat] . [inv_cov | -2*centers*inv_cov]^T + c_row
    # Single MXU contraction over K = 2*Dp, contracting dim 1 of both operands
    # (no transposes).
    lhs = jnp.concatenate([feat * feat, feat], axis=1)              # [TB, 2Dp]
    dn = (((1,), (1,)), ((), ()))
    dist = lax.dot_general(lhs, rhs, dn,
                           preferred_element_type=jnp.float32) + c_row
    dist = jnp.maximum(dist, 0.0)   # expanded form can round slightly negative

    col = lax.broadcasted_iota(jnp.int32, (tb, cp), 1)
    onehot = (col == label).astype(jnp.float32)                     # [TB, Cp]

    base = -0.5 * (slog + dist)
    if cp != num_classes:            # static: only emitted when classes padded
        base = jnp.where(col < num_classes, base, jnp.float32(-1e30))

    # Base log_softmax (single exp pass over [TB, Cp]).
    m = jnp.max(base, axis=1, keepdims=True)
    z = base - m
    e = jnp.exp(z)
    s = jnp.sum(e, axis=1, keepdims=True)
    logits = z - jnp.log(s)
    logits_ref[...] = logits.astype(logits_ref.dtype)

    # Margin logits without a second softmax pass:
    #   margin_arg = base - delta * onehot,  delta = 0.5*alpha*dist[b, label[b]]
    #   lse_margin = lse_base + log(1 + p_label*(exp(-delta) - 1))   (exact)
    dist_lab = jnp.sum(onehot * dist, axis=1, keepdims=True)        # [TB, 1]
    delta = (0.5 * alpha) * dist_lab
    p_lab = jnp.sum(onehot * e, axis=1, keepdims=True) / s          # [TB, 1]
    corr = jnp.log(1.0 + p_lab * (jnp.exp(-delta) - 1.0))           # [TB, 1]
    mlogits_ref[...] = (logits - delta * onehot - corr).astype(mlogits_ref.dtype)


def lgm_loss(feat, label, centers, log_covs, alpha, *, tile_b=None):
    """Pallas implementation of LGMLoss.forward.

    Returns (logits, margin_logits, likelihood, cdist, reg) matching torch.
    """
    B, D = feat.shape
    C, D2 = centers.shape
    assert D == D2

    feat = feat.astype(jnp.float32)
    centers = centers.astype(jnp.float32)
    log_covs = log_covs.astype(jnp.float32)
    label = label.astype(jnp.int32)

    # Lane-dense padding: classes and feat_dim to multiples of 128.
    Cp = _round_up(max(C, 1), 128)
    Dp = _round_up(max(D, 1), 128)

    # ---- device-aware tile sizing / VMEM budget ---------------------------
    try:
        vmem_cap = int(pltpu.get_tpu_info().vmem_capacity_bytes)
    except Exception:  # fall back to the smallest (v7x per-TC) capacity
        vmem_cap = 64 * 1024 * 1024
    budget = int(0.8 * vmem_cap)

    # Resident (constant index_map) arrays; BlockSpec double-buffers them by
    # default, so count them twice.
    resident_bytes = 2 * 4 * (Cp * 2 * Dp + 2 * Cp)
    # Per batch-row bytes: double-buffered feat/label tiles + two double-
    # buffered [., Cp] output tiles + in-kernel temporaries (lhs + ~4 live
    # [., Cp] arrays).
    per_row = 4 * (2 * Dp + 2 * 128 + 2 * 2 * Cp + 2 * Dp + 4 * Cp)

    if tile_b is None:
        fit = max(8, ((budget - resident_bytes) // max(per_row, 1)) // 8 * 8)
        tile_b = int(min(512, fit, _round_up(max(B, 1), 8)))
        # Keep >= 2 grid steps when possible so the "parallel" batch axis can
        # split across both TensorCores on v7x (harmless on v5e/v6e).
        if B > 8 and B <= tile_b:
            tile_b = max(8, _round_up((B + 1) // 2, 8))
    # TODO(synk): for very large num_classes (resident [Cp,2Dp] no longer fits
    # VMEM) add a second "arbitrary" class-tile grid axis with an online softmax.

    Bp = _round_up(max(B, 1), tile_b)
    num_tiles = Bp // tile_b

    feat_p = jnp.zeros((Bp, Dp), jnp.float32).at[:B, :D].set(feat)
    label_p = jnp.zeros((Bp, 1), jnp.int32).at[:B, 0].set(label)
    centers_p = jnp.zeros((Cp, Dp), jnp.float32).at[:C, :D].set(centers)
    log_covs_p = jnp.zeros((Cp, Dp), jnp.float32).at[:C, :D].set(log_covs)

    # Parameter-only setup, hoisted out of the batch-tiled loop (once per
    # launch, not per tile).
    inv_cov = jnp.exp(-log_covs_p)                                        # [Cp, Dp]
    rhs = jnp.concatenate([inv_cov, -2.0 * centers_p * inv_cov], axis=1)  # [Cp, 2Dp]
    c_row = jnp.sum(centers_p * centers_p * inv_cov, axis=-1)[None, :]    # [1, Cp]
    slog = jnp.sum(log_covs_p, axis=-1)[None, :]                          # [1, Cp]

    kernel = functools.partial(_lgm_kernel, alpha=float(alpha), num_classes=C)

    cost = pl.CostEstimate(
        flops=int(2 * Bp * Cp * (2 * Dp) + 12 * Bp * Cp),
        transcendentals=int(Bp * Cp + 4 * Bp),
        bytes_accessed=int(4 * (Bp * Dp + Bp + Cp * 2 * Dp + 2 * Cp
                                + 2 * Bp * Cp)),
    )

    vmem_limit = int(min(vmem_cap - 4 * 1024 * 1024,
                         max(budget, 32 * 1024 * 1024)))

    logits_p, mlogits_p = pl.pallas_call(
        kernel,
        grid=(num_tiles,),
        in_specs=[
            pl.BlockSpec((tile_b, Dp), lambda i: (i, 0)),    # feat tile
            pl.BlockSpec((tile_b, 1), lambda i: (i, 0)),     # label tile
            pl.BlockSpec((Cp, 2 * Dp), lambda i: (0, 0)),    # [inv_cov | -2*c*inv_cov]
            pl.BlockSpec((1, Cp), lambda i: (0, 0)),         # sum centers^2*inv_cov
            pl.BlockSpec((1, Cp), lambda i: (0, 0)),         # sum log_covs
        ],
        out_specs=(
            pl.BlockSpec((tile_b, Cp), lambda i: (i, 0)),    # logits tile
            pl.BlockSpec((tile_b, Cp), lambda i: (i, 0)),    # margin_logits tile
        ),
        out_shape=(
            jax.ShapeDtypeStruct((Bp, Cp), jnp.float32),
            jax.ShapeDtypeStruct((Bp, Cp), jnp.float32),
        ),
        compiler_params=pltpu.CompilerParams(
            dimension_semantics=("parallel",),
            vmem_limit_bytes=vmem_limit),
        cost_estimate=cost,
    )(feat_p, label_p, rhs, c_row, slog)

    logits = logits_p[:B, :C]
    mlogits = mlogits_p[:B, :C]

    # Scalar reductions: an O(B*D) gather is cheaper in the XLA wrapper than an
    # onehot@centers MXU matmul inside the kernel.
    cdiff = feat - centers[label]
    cdist = 0.5 * jnp.sum(cdiff * cdiff)
    batch_det = jnp.sum(jnp.sum(log_covs, axis=-1)[label])
    reg = 0.5 * (batch_det + 1e-8)
    likelihood = (cdist - reg) / B
    return logits, mlogits, likelihood, cdist, reg


def _reference(feat, label, centers, log_covs, alpha):
    """Plain-JAX reference mirroring the torch code, for a sanity check."""
    B = feat.shape[0]
    C = centers.shape[0]
    covs = jnp.exp(log_covs)[None]                               # [1, C, D]
    diff = feat[:, None, :] - centers[None, :, :]                # [B, C, D]
    dist = jnp.sum(diff * (diff / covs), axis=-1)                # [B, C]
    onehot = jax.nn.one_hot(label, C, dtype=jnp.float32) * alpha + 1.0
    margin_dist = dist * onehot
    slog = jnp.sum(log_covs, axis=-1)[None]                      # [1, C]
    margin_logits = jax.nn.log_softmax(-0.5 * (slog + margin_dist), axis=1)
    logits = jax.nn.log_softmax(-0.5 * (slog + dist), axis=1)
    cdiff = feat - centers[label]
    cdist = jnp.sum(cdiff ** 2) / 2.0
    batch_det = jnp.sum(jnp.sum(log_covs, axis=-1)[label])
    reg = 0.5 * (batch_det + 1e-8)
    likelihood = (cdist - reg) / B
    return logits, margin_logits, likelihood, cdist, reg


if __name__ == "__main__":
    # Config consistent with LGMLoss(num_classes, feat_dim, alpha).
    num_classes = 16
    feat_dim = 32
    alpha = 0.1
    batch = 8

    key = jax.random.PRNGKey(0)
    k_centers, k_feat, k_label = jax.random.split(key, 3)

    # Deterministic parameter init: centers ~ randn, log_covs = zeros (as in __init__).
    centers = jax.random.normal(k_centers, (num_classes, feat_dim), dtype=jnp.float32)
    log_covs = jnp.zeros((num_classes, feat_dim), dtype=jnp.float32)

    feat = jax.random.normal(k_feat, (batch, feat_dim), dtype=jnp.float32)
    label = jax.random.randint(k_label, (batch,), 0, num_classes, dtype=jnp.int32)

    outs = jax.block_until_ready(lgm_loss(feat, label, centers, log_covs, alpha))
    refs = _reference(feat, label, centers, log_covs, alpha)
    for o, r in zip(outs, refs):
        assert jnp.allclose(o, r, atol=1e-4, rtol=1e-4), (o, r)

    # Second config: >= 2 batch tiles, padded classes and non-trivial log_covs,
    # exercising the tiled / parallel-grid path.
    B2, C2, D2 = 48, 200, 64
    k1, k2, k3, k4 = jax.random.split(jax.random.PRNGKey(0), 4)
    centers2 = jax.random.normal(k1, (C2, D2), dtype=jnp.float32)
    log_covs2 = 0.1 * jax.random.normal(k2, (C2, D2), dtype=jnp.float32)
    feat2 = jax.random.normal(k3, (B2, D2), dtype=jnp.float32)
    label2 = jax.random.randint(k4, (B2,), 0, C2, dtype=jnp.int32)

    outs2 = jax.block_until_ready(lgm_loss(feat2, label2, centers2, log_covs2, alpha))
    refs2 = _reference(feat2, label2, centers2, log_covs2, alpha)
    for o, r in zip(outs2, refs2):
        assert jnp.allclose(o, r, atol=1e-4, rtol=1e-4), (o, r)

    print("KERNEL_OK")
</pallas_src>

<mosaic_0001>
module attributes {stable_mosaic.version = 11 : i64} {
  func.func @_lgm_kernel(%arg0: i32, %arg1: memref<8x128xf32, #tpu.memory_space<vmem>>, %arg2: memref<8x1xi32, #tpu.memory_space<vmem>>, %arg3: memref<128x256xf32, #tpu.memory_space<vmem>>, %arg4: memref<1x128xf32, #tpu.memory_space<vmem>>, %arg5: memref<1x128xf32, #tpu.memory_space<vmem>>, %arg6: memref<8x128xf32, #tpu.memory_space<vmem>>, %arg7: memref<8x128xf32, #tpu.memory_space<vmem>>) attributes {dimension_semantics = [#tpu.dimension_semantics<parallel>], iteration_bounds = array<i64: 1>, scalar_prefetch = 0 : i64, scratch_operands = 0 : i64, tpu.core_type = #tpu.core_type<tc>, window_params = [{transform_indices = @transform_0, window_bounds = array<i64: 8, 128>}, {transform_indices = @transform_1, window_bounds = array<i64: 8, 1>}, {pipeline_mode = #tpu.pipeline_mode<synchronous>, transform_indices = @transform_2, window_bounds = array<i64: 128, 256>}, {pipeline_mode = #tpu.pipeline_mode<synchronous>, transform_indices = @transform_3, window_bounds = array<i64: 1, 128>}, {pipeline_mode = #tpu.pipeline_mode<synchronous>, transform_indices = @transform_4, window_bounds = array<i64: 1, 128>}, {transform_indices = @transform_5, window_bounds = array<i64: 8, 128>}, {transform_indices = @transform_6, window_bounds = array<i64: 8, 128>}]} {
    %c0 = arith.constant 0 : index
    %c0_0 = arith.constant 0 : index
    %0 = vector.load %arg1[%c0, %c0_0] : memref<8x128xf32, #tpu.memory_space<vmem>>, vector<8x128xf32>
    %c0_1 = arith.constant 0 : index
    %c0_2 = arith.constant 0 : index
    %1 = vector.load %arg2[%c0_1, %c0_2] : memref<8x1xi32, #tpu.memory_space<vmem>>, vector<8x1xi32>
    %c0_3 = arith.constant 0 : index
    %c0_4 = arith.constant 0 : index
    %2 = vector.load %arg3[%c0_3, %c0_4] : memref<128x256xf32, #tpu.memory_space<vmem>>, vector<128x256xf32>
    %c0_5 = arith.constant 0 : index
    %c0_6 = arith.constant 0 : index
    %3 = vector.load %arg4[%c0_5, %c0_6] : memref<1x128xf32, #tpu.memory_space<vmem>>, vector<1x128xf32>
    %c0_7 = arith.constant 0 : index
    %c0_8 = arith.constant 0 : index
    %4 = vector.load %arg5[%c0_7, %c0_8] : memref<1x128xf32, #tpu.memory_space<vmem>>, vector<1x128xf32>
    %5 = arith.mulf %0, %0 : vector<8x128xf32>
    %6 = tpu.concatenate %5, %0 in 1 : vector<8x128xf32>, vector<8x128xf32> -> vector<8x256xf32>
    %cst = arith.constant dense<0.000000e+00> : vector<8x128xf32>
    %7 = tpu.matmul %6, %2, %cst {dimension_numbers = #tpu.dot_dimension_numbers<[1], [1], [0], [0], [0, 0, 1, 0], [], []>} : vector<8x256xf32>, vector<128x256xf32>, vector<8x128xf32> -> vector<8x128xf32>
    %8 = vector.broadcast %3 : vector<1x128xf32> to vector<8x128xf32>
    %9 = arith.addf %7, %8 : vector<8x128xf32>
    %cst_9 = arith.constant 0.000000e+00 : f32
    %10 = vector.broadcast %cst_9 : f32 to vector<8x128xf32>
    %11 = arith.maximumf %9, %10 : vector<8x128xf32>
    %12 = tpu.iota {dimensions = array<i32: 1>} : vector<8x128xi32>
    %13 = vector.broadcast %1 : vector<8x1xi32> to vector<8x128xi32>
    %14 = arith.cmpi eq, %12, %13 : vector<8x128xi32>
    %15 = arith.extui %14 : vector<8x128xi1> to vector<8x128xi32>
    %16 = arith.sitofp %15 : vector<8x128xi32> to vector<8x128xf32>
    %17 = vector.broadcast %4 : vector<1x128xf32> to vector<8x128xf32>
    %18 = arith.addf %17, %11 : vector<8x128xf32>
    %cst_10 = arith.constant -5.000000e-01 : f32
    %19 = vector.broadcast %cst_10 : f32 to vector<8x128xf32>
    %20 = arith.mulf %19, %18 : vector<8x128xf32>
    %c16_i32 = arith.constant 16 : i32
    %21 = vector.broadcast %c16_i32 : i32 to vector<8x128xi32>
    %22 = arith.cmpi slt, %12, %21 : vector<8x128xi32>
    %cst_11 = arith.constant -1.000000e+30 : f32
    %23 = vector.broadcast %cst_11 : f32 to vector<8x128xf32>
    %24 = arith.select %22, %20, %23 : vector<8x128xi1>, vector<8x128xf32>
    %cst_12 = arith.constant dense<0xFF800000> : vector<8xf32>
    %25 = vector.multi_reduction <maximumf>, %24, %cst_12 [1] : vector<8x128xf32> to vector<8xf32>
    %26 = vector.shape_cast %25 : vector<8xf32> to vector<8x1xf32>
    %27 = vector.broadcast %26 : vector<8x1xf32> to vector<8x128xf32>
    %28 = arith.subf %24, %27 : vector<8x128xf32>
    %29 = math.exp %28 : vector<8x128xf32>
    %cst_13 = arith.constant dense<0.000000e+00> : vector<8xf32>
    %30 = vector.multi_reduction <add>, %29, %cst_13 [1] : vector<8x128xf32> to vector<8xf32>
    %31 = vector.shape_cast %30 : vector<8xf32> to vector<8x1xf32>
    %32 = math.log %31 : vector<8x1xf32>
    %33 = vector.broadcast %32 : vector<8x1xf32> to vector<8x128xf32>
    %34 = arith.subf %28, %33 : vector<8x128xf32>
    %c0_14 = arith.constant 0 : index
    %c0_15 = arith.constant 0 : index
    %35 = vector.load %arg6[%c0_14, %c0_15] : memref<8x128xf32, #tpu.memory_space<vmem>>, vector<8x128xf32>
    tpu.vector_store %arg6[%c0_14, %c0_15], %34 {strides = array<i32>} : memref<8x128xf32, #tpu.memory_space<vmem>>, vector<8x128xf32>,
    %36 = arith.mulf %16, %11 : vector<8x128xf32>
    %cst_16 = arith.constant dense<0.000000e+00> : vector<8xf32>
    %37 = vector.multi_reduction <add>, %36, %cst_16 [1] : vector<8x128xf32> to vector<8xf32>
    %38 = vector.shape_cast %37 : vector<8xf32> to vector<8x1xf32>
    %cst_17 = arith.constant 5.000000e-02 : f32
    %39 = vector.broadcast %cst_17 : f32 to vector<8x1xf32>
    %40 = arith.mulf %39, %38 : vector<8x1xf32>
    %41 = arith.mulf %16, %29 : vector<8x128xf32>
    %cst_18 = arith.constant dense<0.000000e+00> : vector<8xf32>
    %42 = vector.multi_reduction <add>, %41, %cst_18 [1] : vector<8x128xf32> to vector<8xf32>
    %43 = vector.shape_cast %42 : vector<8xf32> to vector<8x1xf32>
    %44 = arith.divf %43, %31 : vector<8x1xf32>
    %cst_19 = arith.constant 0.000000e+00 : f32
    %45 = vector.broadcast %cst_19 : f32 to vector<8x1xf32>
    %46 = arith.subf %45, %40 : vector<8x1xf32>
    %47 = math.exp %46 : vector<8x1xf32>
    %cst_20 = arith.constant 1.000000e+00 : f32
    %48 = vector.broadcast %cst_20 : f32 to vector<8x1xf32>
    %49 = arith.subf %47, %48 : vector<8x1xf32>
    %50 = arith.mulf %44, %49 : vector<8x1xf32>
    %cst_21 = arith.constant 1.000000e+00 : f32
    %51 = vector.broadcast %cst_21 : f32 to vector<8x1xf32>
    %52 = arith.addf %51, %50 : vector<8x1xf32>
    %53 = math.log %52 : vector<8x1xf32>
    %54 = vector.broadcast %40 : vector<8x1xf32> to vector<8x128xf32>
    %55 = arith.mulf %54, %16 : vector<8x128xf32>
    %56 = arith.subf %34, %55 : vector<8x128xf32>
    %57 = vector.broadcast %53 : vector<8x1xf32> to vector<8x128xf32>
    %58 = arith.subf %56, %57 : vector<8x128xf32>
    %c0_22 = arith.constant 0 : index
    %c0_23 = arith.constant 0 : index
    %59 = vector.load %arg7[%c0_22, %c0_23] : memref<8x128xf32, #tpu.memory_space<vmem>>, vector<8x128xf32>
    tpu.vector_store %arg7[%c0_22, %c0_23], %58 {strides = array<i32>} : memref<8x128xf32, #tpu.memory_space<vmem>>, vector<8x128xf32>,
    return
  }
  func.func @transform_0(%arg0: i32) -> (i32, i32) {
    %c0_i32 = arith.constant 0 : i32
    %c0_i32_0 = arith.constant 0 : i32
    return %arg0, %c0_i32 : i32, i32
  }
  func.func @transform_1(%arg0: i32) -> (i32, i32) {
    %c0_i32 = arith.constant 0 : i32
    %c0_i32_0 = arith.constant 0 : i32
    return %arg0, %c0_i32 : i32, i32
  }
  func.func @transform_2(%arg0: i32) -> (i32, i32) {
    %c0_i32 = arith.constant 0 : i32
    %c0_i32_0 = arith.constant 0 : i32
    %c0_i32_1 = arith.constant 0 : i32
    return %c0_i32, %c0_i32_0 : i32, i32
  }
  func.func @transform_3(%arg0: i32) -> (i32, i32) {
    %c0_i32 = arith.constant 0 : i32
    %c0_i32_0 = arith.constant 0 : i32
    %c0_i32_1 = arith.constant 0 : i32
    return %c0_i32, %c0_i32_0 : i32, i32
  }
  func.func @transform_4(%arg0: i32) -> (i32, i32) {
    %c0_i32 = arith.constant 0 : i32
    %c0_i32_0 = arith.constant 0 : i32
    %c0_i32_1 = arith.constant 0 : i32
    return %c0_i32, %c0_i32_0 : i32, i32
  }
  func.func @transform_5(%arg0: i32) -> (i32, i32) {
    %c0_i32 = arith.constant 0 : i32
    %c0_i32_0 = arith.constant 0 : i32
    return %arg0, %c0_i32 : i32, i32
  }
  func.func @transform_6(%arg0: i32) -> (i32, i32) {
    %c0_i32 = arith.constant 0 : i32
    %c0_i32_0 = arith.constant 0 : i32
    return %arg0, %c0_i32 : i32, i32
  }
}

</mosaic_0001>

<bundles_post_ra>
// kernel: tpu_custom_call.1
= control target key start
LH: loop header
LB: loop body
LE: loop exit
PB: predicated region body
PF: predicated region fallthrough
CT: control target
= control target key end

     0   :  { %12 = vsyncpa [#allocation3], 0  ;;  %s377_s0 = inlined_call_operand.vmem [shape: f32[8,128], index: 0, kind: input, shape index: {}]   ;;  %s378_s1 = inlined_call_operand.vmem [shape: s32[8,1], index: 1, kind: input, shape index: {}]   ;;  %s379_s2 = inlined_call_operand.hbm [shape: f32[128,256], index: 2, kind: input, shape index: {}]   ;;  %s380_s3 = inlined_call_operand.vmem [shape: f32[1,128], index: 3, kind: input, shape index: {}]   ;;  %s381_s4 = inlined_call_operand.vmem [shape: f32[1,128], index: 4, kind: input, shape index: {}]   ;;  %s382_s5 = inlined_call_operand.hbm [shape: f32[8,128], index: 5, kind: output, shape index: {0}]   ;;  %s383_s6 = inlined_call_operand.hbm [shape: f32[8,128], index: 6, kind: output, shape index: {1}]  }
   0x1   :  { %13 = vsyncpa [#allocation4], 0 }
   0x2   :  { %14 = vsyncpa [#allocation7], 0  ;;  %s23_s23 = sshll.u32 %s379_s2, 4  ;;  %s314_s24 = smov [#allocation2]   ;;  %s24_s23 = int_to_ptr.hbm [resolvable:$true] %s23_s23 }
   0x3   :  { %s25_s25 = sshll.u32 %s314_s24, 4  ;;  %s315_s26 = smov 256   ;;  %s26_s25 = int_to_ptr.vmem [resolvable:$true] %s25_s25 }
   0x4   :  { %s316_s27 = smov 16  }
   0x5   :  { %31 = dma.hbm_to_vmem [thread:$0]  %s24_s23, 4096, %s26_s25, [#allocation3], %s315_s26, %s315_s26, %s316_s27  }
   0x6   :  { %308 = dma.done.wait [#allocation3], 4096  }
   0x7   :  { %309 = vsyncadd [#allocation3], 4294963200  ;;  %v72_v0 = vld [vmem:[#allocation2 + $0xf0] sm:$0xff]  ;;  %v73_v1 = vld [vmem:[#allocation2 + $0xf8] sm:$0xff]  ;;  %v317_v34 = vmov 0   ;;  %v121_v38 = vlaneseq  ;;  %v318_v53 = vmov 0.0  }
   0x8   :  { %80 = vmatpush.xpose.msra.mxu0 %v72_v0  ;;  %100 = vmatpush.xpose.msra.mxu1 %v73_v1  ;;  %v70_v2 = vld [vmem:[#allocation2 + $0xe0] sm:$0xff]  ;;  %v71_v3 = vld [vmem:[#allocation2 + $0xe8] sm:$0xff]  ;;  %v68_v4 = vld [vmem:[#allocation2 + $0xd0] sm:$0xff]  ;;  %s188_s11 = sshll.u32 %s382_s5, 4  ;;  %s320_s5 = smov [#allocation6]   ;;  %s189_s11 = int_to_ptr.hbm [resolvable:$true] %s188_s11 }
   0x9   :  { %v69_v5 = vld [vmem:[#allocation2 + $0xd8] sm:$0xff]  ;;  %v66_v6 = vld [vmem:[#allocation2 + $0xc0] sm:$0xff]  ;;  %v67_v7 = vld [vmem:[#allocation2 + $0xc8] sm:$0xff]  ;;  %223 = vset.pattern.permute.xlu0 %v317_v34  ;;  %v122_v42 = vand.u32 127, %v121_v38  ;;  %s197_s12 = sshll.u32 %s320_s5, 4  ;;  %s199_s15 = sshll.u32 %s383_s6, 4  ;;  %s198_s12 = int_to_ptr.vmem [resolvable:$true] %s197_s12  ;;  %s200_s15 = int_to_ptr.hbm [resolvable:$true] %s199_s15 }
   0xa   :  { %v64_v8 = vld [vmem:[#allocation2 + $0xb0] sm:$0xff]  ;;  %v65_v9 = vld [vmem:[#allocation2 + $0xb8] sm:$0xff]  ;;  %v62_v10 = vld [vmem:[#allocation2 + $0xa0] sm:$0xff] }
   0xb   :  { %v63_v11 = vld [vmem:[#allocation2 + $0xa8] sm:$0xff]  ;;  %v60_v12 = vld [vmem:[#allocation2 + $0x90] sm:$0xff]  ;;  %v61_v13 = vld [vmem:[#allocation2 + $0x98] sm:$0xff]  ;;  %vm134_vm0 = vcmp.lt.s32.totalorder %v122_v42, 16 }
   0xc   :  { %81 = vmatpush.xpose.msra.mxu0 %v70_v2  ;;  %101 = vmatpush.xpose.msra.mxu1 %v71_v3  ;;  %v58_v14 = vld [vmem:[#allocation2 + $0x80] sm:$0xff]  ;;  %v59_v15 = vld [vmem:[#allocation2 + $0x88] sm:$0xff]  ;;  %v56_v16 = vld [vmem:[#allocation2 + $0x70] sm:$0xff] }
   0xd   :  { %v57_v17 = vld [vmem:[#allocation2 + $0x78] sm:$0xff]  ;;  %v54_v18 = vld [vmem:[#allocation2 + $0x60] sm:$0xff]  ;;  %v55_v19 = vld [vmem:[#allocation2 + $0x68] sm:$0xff] }
   0xe   :  { %v52_v20 = vld [vmem:[#allocation2 + $0x50] sm:$0xff]  ;;  %v53_v21 = vld [vmem:[#allocation2 + $0x58] sm:$0xff]  ;;  %v50_v22 = vld [vmem:[#allocation2 + $0x40] sm:$0xff] }
   0xf   :  { %v51_v23 = vld [vmem:[#allocation2 + $0x48] sm:$0xff]  ;;  %v48_v24 = vld [vmem:[#allocation2 + $0x30] sm:$0xff]  ;;  %v49_v25 = vld [vmem:[#allocation2 + $0x38] sm:$0xff] }
  0x10   :  { %82 = vmatpush.xpose.msra.mxu0 %v68_v4  ;;  %102 = vmatpush.xpose.msra.mxu1 %v69_v5  ;;  %v46_v26 = vld [vmem:[#allocation2 + $0x20] sm:$0xff]  ;;  %v47_v27 = vld [vmem:[#allocation2 + $0x28] sm:$0xff]  ;;  %v44_v28 = vld [vmem:[#allocation2 + $0x10] sm:$0xff] }
  0x11   :  { %v45_v29 = vld [vmem:[#allocation2 + $0x18] sm:$0xff]  ;;  %v40_v30 = vld [vmem:[%s377_s0] sm:$0xff]  ;;  %v43_v32 = vld [vmem:[#allocation2 + $0x8] sm:$0xff] }
  0x12   :  { %v42_v31 = vld [vmem:[#allocation2] sm:$0xff]  ;;  %v76_v33 = vmul.f32 %v40_v30, %v40_v30 }
  0x13   :  { %v224_v35 = vld [vmem:[%s380_s3] ss:$0 sm:$0xff] }
  0x14   :  { %83 = vmatpush.xpose.msra.mxu0 %v66_v6  ;;  %103 = vmatpush.xpose.msra.mxu1 %v67_v7  ;;  %v225_v41 = vld [vmem:[%s381_s4] ss:$0 sm:$0xff] }
  0x15   :  { %v41_v47 = vld [vmem:[%s378_s1] sm:$0xff]  ;;  %s319_s1 = smov [#allocation5]  }
  0x16   :  { %s186_s3 = sshll.u32 %s319_s1, 4  ;;  %s187_s3 = int_to_ptr.vmem [resolvable:$true] %s186_s3 }
  0x18   :  { %84 = vmatpush.xpose.msra.mxu0 %v64_v8  ;;  %104 = vmatpush.xpose.msra.mxu1 %v65_v9 }
  0x1c   :  { %85 = vmatpush.xpose.msra.mxu0 %v62_v10  ;;  %105 = vmatpush.xpose.msra.mxu1 %v63_v11 }
  0x20   :  { %86 = vmatpush.xpose.msra.mxu0 %v60_v12  ;;  %106 = vmatpush.xpose.msra.mxu1 %v61_v13 }
  0x24   :  { %87 = vmatpush.xpose.msra.mxu0 %v58_v14  ;;  %107 = vmatpush.xpose.msra.mxu1 %v59_v15 }
  0x28   :  { %88 = vmatpush.xpose.msra.mxu0 %v56_v16  ;;  %108 = vmatpush.xpose.msra.mxu1 %v57_v17 }
  0x2c   :  { %89 = vmatpush.xpose.msra.mxu0 %v54_v18  ;;  %109 = vmatpush.xpose.msra.mxu1 %v55_v19 }
  0x30   :  { %90 = vmatpush.xpose.msra.mxu0 %v52_v20  ;;  %110 = vmatpush.xpose.msra.mxu1 %v53_v21 }
  0x34   :  { %91 = vmatpush.xpose.msra.mxu0 %v50_v22  ;;  %111 = vmatpush.xpose.msra.mxu1 %v51_v23 }
  0x38   :  { %92 = vmatpush.xpose.msra.mxu0 %v48_v24  ;;  %112 = vmatpush.xpose.msra.mxu1 %v49_v25 }
  0x3c   :  { %93 = vmatpush.xpose.msra.mxu0 %v46_v26  ;;  %113 = vmatpush.xpose.msra.mxu1 %v47_v27 }
  0x40   :  { %94 = vmatpush.xpose.msra.mxu0 %v44_v28  ;;  %114 = vmatpush.xpose.msra.mxu1 %v45_v29 }
  0x44   :  { %95 = vmatpush.xpose.msra.mxu0 %v42_v31  ;;  %115 = vmatpush.xpose.msra.mxu1 %v43_v32 }
  0x47   :  { %96 = vmatmul.f32.vlgmr.msra.gmra.mxu0 %v76_v33  ;;  %116 = vmatmul.f32.vlgmr.msra.gmra.mxu1 %v40_v30 }
  0xc4   :  { %v97_v36 = vpop.f32.mrf.mxu0  ;;  %v117_v37 = vpop.f32.mrf.mxu1 }
  0xc5   :  { %v98_v39 = vadd.f32 %v224_v35, %v97_v36 }
  0xc7   :  { %v118_v40 = vadd.f32 %v117_v37, %v98_v39 }
  0xc9   :  { %v120_v43 = vmax.f32 %v118_v40, 0.0 }
  0xcb   :  { %v132_v44 = vadd.f32 %v225_v41, %v120_v43 }
  0xcd   :  { %v133_v45 = vmul.f32 -0.5, %v132_v44 }
  0xcf   :  { %v135_v46 = vsel %vm134_vm0, %v133_v45, -1e+30 }
  0xd0   :  { %136 = vmax.xlane.f32.xlu0 %v135_v46 }
  0xe4   :  { %124 = vperm.xlu0 %223, %v41_v47  }
 0x143   :  { %v137_v48 = vpop.xlane.xlu0 %136 }
 0x144   :  { %v138_v49 = vsub.f32 %v135_v46, %v137_v48 }
 0x146   :  { %v139_v50 = vmul.f32 1.442695, %v138_v49 }
 0x148   :  { %226 = vpow2.f32 %v139_v50 }
 0x14e   :  { %v227_v51 = vpop.eup %226 }
 0x14f   :  { %141 = vadd.xlane.f32.xlu1 %v227_v51 }
 0x156   :  { %v125_v52 = vpop.permute.xlu0 %124 }
 0x157   :  { %vm126_vm1 = vcmp.eq.s32.totalorder %v122_v42, %v125_v52 }
 0x158   :  { %v214_v54 = vsel %vm126_vm1, 1.0, %v318_v53 }
 0x159   :  { %v151_v55 = vmul.f32 %v227_v51, %v214_v54  ;;  %v147_v56 = vmul.f32 %v214_v54, %v120_v43 }
 0x15b   :  { %152 = vadd.xlane.f32.xlu2 %v151_v55  ;;  %148 = vadd.xlane.f32.xlu1 %v147_v56 }
 0x1c2   :  { %v142_v57 = vpop.xlane.xlu1 %141 }
 0x1c3   :  { %228 = vrcp.f32 %v142_v57  ;;  %v165_v5 = vand.u32 2147483648, %v142_v57  ;;  %vm159_vm3 = vweird.f32 %v142_v57  ;;  %v163_v7 = vand.u32 2147483647, %v142_v57 }
 0x1c4   :  { %230 = vlog2.f32 %v142_v57 }
 0x1c5   :  { %v166_v9 = vor.u32 1.1754944e-38, %v165_v5  ;;  %vm164_vm5 = vcmp.eq.f32.partialorder %v163_v7, 8.507059e+37 }
 0x1c9   :  { %v229_v58 = vpop.eup %228 }
 0x1ca   :  { %v231_v59 = vpop.eup %230  ;;  %v155_v60 = vmul.f32 %v229_v58, %v142_v57  ;;  %vm160_vm2 = vweird.f32 %v229_v58 }
 0x1cb   :  { %v144_v61 = vmul.f32 0.6931472, %v231_v59  ;;  %vm161_vm4 = vmor %vm159_vm3, %vm160_vm2 }
 0x1cc   :  { %v156_v62 = vsub.f32 1.0, %v155_v60 }
 0x1cd   :  { %v145_v63 = vsub.f32 %v138_v49, %v144_v61 }
 0x1ce   :  { %v157_v0 = vmul.f32 %v229_v58, %v156_v62  ;;  %v149_v1 = vpop.xlane.xlu1 %148  ;;  %v153_v12 = vpop.xlane.xlu2 %152 }
 0x1cf   :  { %v150_v2 = vmul.f32 0.05, %v149_v1  ;;  %146 = vst [vmem:[#allocation5] sm:$0xff] %v145_v63 }
 0x1d0   :  { %191 = dma.vmem_to_hbm [thread:$0]  %s187_s3, 128, %s189_s11, [#allocation4]   ;;  %v158_v4 = vadd.f32 %v229_v58, %v157_v0 }
 0x1d1   :  { %v169_v3 = vsub.f32 0.0, %v150_v2  ;;  %v177_v17 = vmul.f32 %v214_v54, %v150_v2 }
 0x1d2   :  { %v162_v8 = vsel %vm161_vm4, %v229_v58, %v158_v4 }
 0x1d3   :  { %v170_v6 = vmul.f32 1.442695, %v169_v3  ;;  %v167_v10 = vsel %vm164_vm5, %v166_v9, %v162_v8  ;;  %v178_v19 = vsub.f32 %v145_v63, %v177_v17 }
 0x1d4   :  { %v168_v13 = vmul.f32 %v167_v10, %v153_v12 }
 0x1d5   :  { %232 = vpow2.f32 %v170_v6 }
 0x1db   :  { %v233_v11 = vpop.eup %232 }
 0x1dc   :  { %v215_v14 = vadd.f32 -1.0, %v233_v11 }
 0x1de   :  { %v173_v15 = vmul.f32 %v215_v14, %v168_v13 }
 0x1e0   :  { %v174_v16 = vadd.f32 1.0, %v173_v15 }
 0x1e2   :  { %234 = vlog2.f32 %v174_v16 }
 0x1e8   :  { %v235_v18 = vpop.eup %234 }
 0x1e9   :  { %v176_v20 = vmul.f32 0.6931472, %v235_v18 }
 0x1eb   :  { %v179_v21 = vsub.f32 %v178_v19, %v176_v20 }
 0x1ed   :  { %180 = vst [vmem:[#allocation6] sm:$0xff] %v179_v21 }
 0x1ee   :  { %202 = dma.vmem_to_hbm [thread:$0]  %s198_s12, 128, %s200_s15, [#allocation7]  }
 0x1ef   :  { %310 = dma.done.wait [#allocation4], 128  }
 0x1f0   :  { %311 = vsyncadd [#allocation4], 4294967168 }
 0x1f1   :  { %312 = dma.done.wait [#allocation7], 128  }
 0x1f2   :  { %313 = vsyncadd [#allocation7], 4294967168 }
 0x1f3   :  { %211 = vsyncpa [#allocation3], 1 }
 0x1f4   :  { %212 = vsyncpa [#allocation4], 1 }
 0x1f5   :  { %213 = vsyncpa [#allocation7], 1 }

</bundles_post_ra>
